<compile_context>
chip_gen: v7x
topology: tpu7x:2x2x1
jax: 0.10.0
libtpu: 0.0.40
codegen_flags: <defaults>
</compile_context>

<pallas_src>
from functools import partial

import numpy as np
import jax
import jax.numpy as jnp
from jax.experimental import pallas as pl
from jax.experimental.pallas import tpu as pltpu


def _round_up(x, m):
    return ((x + m - 1) // m) * m


def _nerf_enc_kernel(x_ref, w_ref, b_ref, m_ref, o_ref, *, include_input):
    """x_ref: (T, G*D) packed row tile; w_ref: (G*D, W) block-diagonal fused
    freq/phase/identity matrix; b_ref: (1, W) phase bias; m_ref: (1, W) raw-input
    pass-through mask; o_ref: (T, W) output tile (W = G*out_dim)."""
    x = x_ref[...]                       # (T, G*D)  f32
    w = w_ref[...]                       # (G*D, W)  f32
    acc = b_ref[...]                     # (1, W) -> broadcasts over rows

    # Pure-VPU outer product: G*D is small and static, so unroll.  Each term is a
    # lane-broadcast column times a sublane-broadcast row; exact f32, no MXU.
    for di in range(x.shape[-1]):
        acc = acc + x[:, di:di + 1] * w[di:di + 1, :]      # (T, W)

    y = jnp.sin(acc)                     # single EUP/VPU sin over the tile
    if include_input:
        # Hoisted mask: 1.0 on lanes where W has identity cols and zero bias,
        # so acc == x there; select the raw value instead of sin(x).
        y = jnp.where(m_ref[...] != 0.0, acc, y)

    o_ref[...] = y.astype(o_ref.dtype)


def nerf_encoding(in_tensor, *, num_frequencies, min_freq_exp, max_freq_exp,
                  include_input=False, tile_groups=8192, out_dtype=jnp.bfloat16):
    """JAX/Pallas equivalent of NeRFEncoding.forward (covs=None)."""
    *bs, D = in_tensor.shape
    N = int(np.prod(bs)) if bs else 1
    x = jnp.asarray(in_tensor, jnp.float32).reshape(N, D)

    F = num_frequencies
    DF = D * F
    out_dim = 2 * DF + (D if include_input else 0)

    # Pack G points per 128-lane output row (G=1 if out_dim already >= 128).
    G = max(1, 128 // out_dim)
    Wout = G * out_dim

    # Per-point fused matrix / bias / mask (2*pi folded into W):
    #   cols [0, DF)       -> 2*pi*freq block (sin half)
    #   cols [DF, 2DF)     -> 2*pi*freq block again (cos half, via +pi/2 bias)
    #   cols [2DF, 2DF+D)  -> identity (raw-input pass-through), if requested
    freqs = 2.0 ** jnp.linspace(min_freq_exp, max_freq_exp, F, dtype=jnp.float32)
    wblk = jnp.kron(jnp.eye(D, dtype=jnp.float32),
                    (2.0 * jnp.pi) * freqs[None, :])                    # (D, DF)
    Wp = jnp.concatenate([wblk, wblk], axis=-1)                          # (D, 2DF)
    bp = jnp.concatenate([jnp.zeros((DF,), jnp.float32),
                          jnp.full((DF,), jnp.pi / 2.0, jnp.float32)])   # (2DF,)
    mp = jnp.zeros((out_dim,), jnp.float32)
    if include_input:
        Wp = jnp.concatenate([Wp, jnp.eye(D, dtype=jnp.float32)], axis=-1)
        bp = jnp.concatenate([bp, jnp.zeros((D,), jnp.float32)])
        mp = mp.at[2 * DF:].set(1.0)

    # Block-diagonal expansion over the G packed points (same freq block per point).
    W = jnp.kron(jnp.eye(G, dtype=jnp.float32), Wp)          # (G*D, G*out_dim)
    b = jnp.tile(bp, (G,))[None, :]                           # (1, G*out_dim)
    m = jnp.tile(mp, (G,))[None, :]                           # (1, G*out_dim)

    # Group rows: pad N only up to a multiple of G (tiny, and only when needed).
    Nround = _round_up(N, G)
    if Nround != N:
        x = jnp.pad(x, ((0, Nround - N), (0, 0)))
    Ng = Nround // G
    xg = x.reshape(Ng, G * D)                                 # free, contiguous

    # Tile selection: big tiles amortize the ~0.35us/step grid overhead; keep
    # >= 2 grid steps on large inputs so v7x's two TensorCores both get work.
    tg = min(tile_groups, Ng)
    if Ng >= 2048:
        tg = min(tg, _round_up(pl.cdiv(Ng, 2), 8))
    if tg < Ng:
        tg = _round_up(tg, 8)     # multi-step: block rows must be multiple of 8
    grid = (pl.cdiv(Ng, tg),)

    kernel = partial(_nerf_enc_kernel, include_input=include_input)

    out = pl.pallas_call(
        kernel,
        out_shape=jax.ShapeDtypeStruct((Ng, Wout), out_dtype),
        grid_spec=pltpu.PrefetchScalarGridSpec(
            num_scalar_prefetch=0,
            grid=grid,
            in_specs=[
                pl.BlockSpec((tg, G * D), lambda i: (i, 0)),     # packed input rows
                pl.BlockSpec((G * D, Wout), lambda i: (0, 0)),   # fused matrix (one DMA)
                pl.BlockSpec((1, Wout), lambda i: (0, 0)),       # phase bias   (one DMA)
                pl.BlockSpec((1, Wout), lambda i: (0, 0)),       # passthrough mask
            ],
            out_specs=pl.BlockSpec((tg, Wout), lambda i: (i, 0)),
        ),
        compiler_params=pltpu.CompilerParams(
            dimension_semantics=("parallel",),
            vmem_limit_bytes=40 * 1024 * 1024,
        ),
    )(xg, W, b, m)

    # (Ng, G*out_dim) -> (Nround, out_dim) is a free row-major relabel; only the
    # (rare) <G-row tail is sliced off.
    out = out.reshape(Nround, out_dim)
    if Nround != N:
        out = out[:N]
    return out.reshape(*bs, out_dim)


def _nerf_encoding_ref(x, *, num_frequencies, min_freq_exp, max_freq_exp, include_input):
    """Pure-JAX reference mirroring the PyTorch code (covs=None)."""
    freqs = 2.0 ** jnp.linspace(min_freq_exp, max_freq_exp, num_frequencies, dtype=jnp.float32)
    scaled = 2.0 * jnp.pi * x
    si = (scaled[..., None] * freqs).reshape(*x.shape[:-1], -1)
    enc = jnp.sin(jnp.concatenate([si, si + jnp.pi / 2.0], axis=-1))
    if include_input:
        enc = jnp.concatenate([enc, x], axis=-1)
    return enc


if __name__ == "__main__":
    key = jax.random.PRNGKey(0)

    # NeRFEncoding(in_dim=3, num_frequencies=4, min_freq_exp=0.0, max_freq_exp=3.0,
    #              include_input=True)
    in_dim = 3
    num_frequencies = 4
    min_freq_exp = 0.0
    max_freq_exp = 3.0
    include_input = True
    expected_out_dim = in_dim * num_frequencies * 2 + (in_dim if include_input else 0)

    # Case 1: small batch, default bf16 output: (*bs, in_dim) = (2, 8, 3)
    k1, k2 = jax.random.split(key)
    x1 = jax.random.uniform(k1, (2, 8, in_dim), dtype=jnp.float32)
    out_bf16 = nerf_encoding(
        x1, num_frequencies=num_frequencies, min_freq_exp=min_freq_exp,
        max_freq_exp=max_freq_exp, include_input=include_input,
    )
    out_bf16 = jax.block_until_ready(out_bf16)
    ref1 = _nerf_encoding_ref(
        x1, num_frequencies=num_frequencies, min_freq_exp=min_freq_exp,
        max_freq_exp=max_freq_exp, include_input=include_input,
    )
    assert out_bf16.shape == (2, 8, expected_out_dim), out_bf16.shape
    assert out_bf16.dtype == jnp.bfloat16
    np.testing.assert_allclose(np.asarray(out_bf16, dtype=np.float32),
                               np.asarray(ref1), rtol=2e-2, atol=1e-2)

    # Case 2: ragged point count (N=7, not a multiple of the pack factor G=4),
    # f32 output for exact-tolerance comparison, include_input=True.
    x2 = jax.random.uniform(k2, (7, in_dim), dtype=jnp.float32)
    out_f32 = nerf_encoding(
        x2, num_frequencies=num_frequencies, min_freq_exp=min_freq_exp,
        max_freq_exp=max_freq_exp, include_input=include_input,
        out_dtype=jnp.float32,
    )
    out_f32 = jax.block_until_ready(out_f32)
    ref2 = _nerf_encoding_ref(
        x2, num_frequencies=num_frequencies, min_freq_exp=min_freq_exp,
        max_freq_exp=max_freq_exp, include_input=include_input,
    )
    assert out_f32.shape == (7, expected_out_dim), out_f32.shape
    assert out_f32.dtype == jnp.float32
    np.testing.assert_allclose(np.asarray(out_f32), np.asarray(ref2),
                               rtol=1e-5, atol=1e-5)

    print("KERNEL_OK")
</pallas_src>

<mosaic_0001>
module attributes {stable_mosaic.version = 11 : i64} {
  func.func @_nerf_enc_kernel(%arg0: i32, %arg1: memref<4x12xf32, #tpu.memory_space<vmem>>, %arg2: memref<12x108xf32, #tpu.memory_space<vmem>>, %arg3: memref<1x108xf32, #tpu.memory_space<vmem>>, %arg4: memref<1x108xf32, #tpu.memory_space<vmem>>, %arg5: memref<4x108xbf16, #tpu.memory_space<vmem>>) attributes {dimension_semantics = [#tpu.dimension_semantics<parallel>], iteration_bounds = array<i64: 1>, scalar_prefetch = 0 : i64, scratch_operands = 0 : i64, tpu.core_type = #tpu.core_type<tc>, window_params = [{transform_indices = @transform_0, window_bounds = array<i64: 4, 12>}, {pipeline_mode = #tpu.pipeline_mode<synchronous>, transform_indices = @transform_1, window_bounds = array<i64: 12, 108>}, {pipeline_mode = #tpu.pipeline_mode<synchronous>, transform_indices = @transform_2, window_bounds = array<i64: 1, 108>}, {pipeline_mode = #tpu.pipeline_mode<synchronous>, transform_indices = @transform_3, window_bounds = array<i64: 1, 108>}, {transform_indices = @transform_4, window_bounds = array<i64: 4, 108>}]} {
    %c0 = arith.constant 0 : index
    %c0_0 = arith.constant 0 : index
    %0 = vector.load %arg1[%c0, %c0_0] : memref<4x12xf32, #tpu.memory_space<vmem>>, vector<4x12xf32>
    %c0_1 = arith.constant 0 : index
    %c0_2 = arith.constant 0 : index
    %1 = vector.load %arg2[%c0_1, %c0_2] : memref<12x108xf32, #tpu.memory_space<vmem>>, vector<12x108xf32>
    %c0_3 = arith.constant 0 : index
    %c0_4 = arith.constant 0 : index
    %2 = vector.load %arg3[%c0_3, %c0_4] : memref<1x108xf32, #tpu.memory_space<vmem>>, vector<1x108xf32>
    %3 = vector.extract_strided_slice %0 {offsets = [0, 0], sizes = [4, 1], strides = [1, 1]} : vector<4x12xf32> to vector<4x1xf32>
    %4 = vector.extract_strided_slice %1 {offsets = [0, 0], sizes = [1, 108], strides = [1, 1]} : vector<12x108xf32> to vector<1x108xf32>
    %5 = vector.broadcast %3 : vector<4x1xf32> to vector<4x108xf32>
    %6 = vector.broadcast %4 : vector<1x108xf32> to vector<4x108xf32>
    %7 = arith.mulf %5, %6 : vector<4x108xf32>
    %8 = vector.broadcast %2 : vector<1x108xf32> to vector<4x108xf32>
    %9 = arith.addf %8, %7 : vector<4x108xf32>
    %10 = vector.extract_strided_slice %0 {offsets = [0, 1], sizes = [4, 1], strides = [1, 1]} : vector<4x12xf32> to vector<4x1xf32>
    %11 = vector.extract_strided_slice %1 {offsets = [1, 0], sizes = [1, 108], strides = [1, 1]} : vector<12x108xf32> to vector<1x108xf32>
    %12 = vector.broadcast %10 : vector<4x1xf32> to vector<4x108xf32>
    %13 = vector.broadcast %11 : vector<1x108xf32> to vector<4x108xf32>
    %14 = arith.mulf %12, %13 : vector<4x108xf32>
    %15 = arith.addf %9, %14 : vector<4x108xf32>
    %16 = vector.extract_strided_slice %0 {offsets = [0, 2], sizes = [4, 1], strides = [1, 1]} : vector<4x12xf32> to vector<4x1xf32>
    %17 = vector.extract_strided_slice %1 {offsets = [2, 0], sizes = [1, 108], strides = [1, 1]} : vector<12x108xf32> to vector<1x108xf32>
    %18 = vector.broadcast %16 : vector<4x1xf32> to vector<4x108xf32>
    %19 = vector.broadcast %17 : vector<1x108xf32> to vector<4x108xf32>
    %20 = arith.mulf %18, %19 : vector<4x108xf32>
    %21 = arith.addf %15, %20 : vector<4x108xf32>
    %22 = vector.extract_strided_slice %0 {offsets = [0, 3], sizes = [4, 1], strides = [1, 1]} : vector<4x12xf32> to vector<4x1xf32>
    %23 = vector.extract_strided_slice %1 {offsets = [3, 0], sizes = [1, 108], strides = [1, 1]} : vector<12x108xf32> to vector<1x108xf32>
    %24 = vector.broadcast %22 : vector<4x1xf32> to vector<4x108xf32>
    %25 = vector.broadcast %23 : vector<1x108xf32> to vector<4x108xf32>
    %26 = arith.mulf %24, %25 : vector<4x108xf32>
    %27 = arith.addf %21, %26 : vector<4x108xf32>
    %28 = vector.extract_strided_slice %0 {offsets = [0, 4], sizes = [4, 1], strides = [1, 1]} : vector<4x12xf32> to vector<4x1xf32>
    %29 = vector.extract_strided_slice %1 {offsets = [4, 0], sizes = [1, 108], strides = [1, 1]} : vector<12x108xf32> to vector<1x108xf32>
    %30 = vector.broadcast %28 : vector<4x1xf32> to vector<4x108xf32>
    %31 = vector.broadcast %29 : vector<1x108xf32> to vector<4x108xf32>
    %32 = arith.mulf %30, %31 : vector<4x108xf32>
    %33 = arith.addf %27, %32 : vector<4x108xf32>
    %34 = vector.extract_strided_slice %0 {offsets = [0, 5], sizes = [4, 1], strides = [1, 1]} : vector<4x12xf32> to vector<4x1xf32>
    %35 = vector.extract_strided_slice %1 {offsets = [5, 0], sizes = [1, 108], strides = [1, 1]} : vector<12x108xf32> to vector<1x108xf32>
    %36 = vector.broadcast %34 : vector<4x1xf32> to vector<4x108xf32>
    %37 = vector.broadcast %35 : vector<1x108xf32> to vector<4x108xf32>
    %38 = arith.mulf %36, %37 : vector<4x108xf32>
    %39 = arith.addf %33, %38 : vector<4x108xf32>
    %40 = vector.extract_strided_slice %0 {offsets = [0, 6], sizes = [4, 1], strides = [1, 1]} : vector<4x12xf32> to vector<4x1xf32>
    %41 = vector.extract_strided_slice %1 {offsets = [6, 0], sizes = [1, 108], strides = [1, 1]} : vector<12x108xf32> to vector<1x108xf32>
    %42 = vector.broadcast %40 : vector<4x1xf32> to vector<4x108xf32>
    %43 = vector.broadcast %41 : vector<1x108xf32> to vector<4x108xf32>
    %44 = arith.mulf %42, %43 : vector<4x108xf32>
    %45 = arith.addf %39, %44 : vector<4x108xf32>
    %46 = vector.extract_strided_slice %0 {offsets = [0, 7], sizes = [4, 1], strides = [1, 1]} : vector<4x12xf32> to vector<4x1xf32>
    %47 = vector.extract_strided_slice %1 {offsets = [7, 0], sizes = [1, 108], strides = [1, 1]} : vector<12x108xf32> to vector<1x108xf32>
    %48 = vector.broadcast %46 : vector<4x1xf32> to vector<4x108xf32>
    %49 = vector.broadcast %47 : vector<1x108xf32> to vector<4x108xf32>
    %50 = arith.mulf %48, %49 : vector<4x108xf32>
    %51 = arith.addf %45, %50 : vector<4x108xf32>
    %52 = vector.extract_strided_slice %0 {offsets = [0, 8], sizes = [4, 1], strides = [1, 1]} : vector<4x12xf32> to vector<4x1xf32>
    %53 = vector.extract_strided_slice %1 {offsets = [8, 0], sizes = [1, 108], strides = [1, 1]} : vector<12x108xf32> to vector<1x108xf32>
    %54 = vector.broadcast %52 : vector<4x1xf32> to vector<4x108xf32>
    %55 = vector.broadcast %53 : vector<1x108xf32> to vector<4x108xf32>
    %56 = arith.mulf %54, %55 : vector<4x108xf32>
    %57 = arith.addf %51, %56 : vector<4x108xf32>
    %58 = vector.extract_strided_slice %0 {offsets = [0, 9], sizes = [4, 1], strides = [1, 1]} : vector<4x12xf32> to vector<4x1xf32>
    %59 = vector.extract_strided_slice %1 {offsets = [9, 0], sizes = [1, 108], strides = [1, 1]} : vector<12x108xf32> to vector<1x108xf32>
    %60 = vector.broadcast %58 : vector<4x1xf32> to vector<4x108xf32>
    %61 = vector.broadcast %59 : vector<1x108xf32> to vector<4x108xf32>
    %62 = arith.mulf %60, %61 : vector<4x108xf32>
    %63 = arith.addf %57, %62 : vector<4x108xf32>
    %64 = vector.extract_strided_slice %0 {offsets = [0, 10], sizes = [4, 1], strides = [1, 1]} : vector<4x12xf32> to vector<4x1xf32>
    %65 = vector.extract_strided_slice %1 {offsets = [10, 0], sizes = [1, 108], strides = [1, 1]} : vector<12x108xf32> to vector<1x108xf32>
    %66 = vector.broadcast %64 : vector<4x1xf32> to vector<4x108xf32>
    %67 = vector.broadcast %65 : vector<1x108xf32> to vector<4x108xf32>
    %68 = arith.mulf %66, %67 : vector<4x108xf32>
    %69 = arith.addf %63, %68 : vector<4x108xf32>
    %70 = vector.extract_strided_slice %0 {offsets = [0, 11], sizes = [4, 1], strides = [1, 1]} : vector<4x12xf32> to vector<4x1xf32>
    %71 = vector.extract_strided_slice %1 {offsets = [11, 0], sizes = [1, 108], strides = [1, 1]} : vector<12x108xf32> to vector<1x108xf32>
    %72 = vector.broadcast %70 : vector<4x1xf32> to vector<4x108xf32>
    %73 = vector.broadcast %71 : vector<1x108xf32> to vector<4x108xf32>
    %74 = arith.mulf %72, %73 : vector<4x108xf32>
    %75 = arith.addf %69, %74 : vector<4x108xf32>
    %76 = math.sin %75 : vector<4x108xf32>
    %c0_5 = arith.constant 0 : index
    %c0_6 = arith.constant 0 : index
    %77 = vector.load %arg4[%c0_5, %c0_6] : memref<1x108xf32, #tpu.memory_space<vmem>>, vector<1x108xf32>
    %cst = arith.constant 0.000000e+00 : f32
    %78 = vector.broadcast %cst : f32 to vector<1x108xf32>
    %79 = arith.cmpf one, %77, %78 : vector<1x108xf32>
    %80 = vector.shape_cast %79 : vector<1x108xi1> to vector<1x108xi1>
    %81 = vector.broadcast %80 : vector<1x108xi1> to vector<4x108xi1>
    %82 = arith.select %81, %75, %76 : vector<4x108xi1>, vector<4x108xf32>
    %83 = arith.truncf %82 : vector<4x108xf32> to vector<4x108xbf16>
    %c0_7 = arith.constant 0 : index
    %c0_8 = arith.constant 0 : index
    %84 = vector.load %arg5[%c0_7, %c0_8] : memref<4x108xbf16, #tpu.memory_space<vmem>>, vector<4x108xbf16>
    tpu.vector_store %arg5[%c0_7, %c0_8], %83 {strides = array<i32>} : memref<4x108xbf16, #tpu.memory_space<vmem>>, vector<4x108xbf16>,
    return
  }
  func.func @transform_0(%arg0: i32) -> (i32, i32) {
    %c0_i32 = arith.constant 0 : i32
    %c0_i32_0 = arith.constant 0 : i32
    return %arg0, %c0_i32 : i32, i32
  }
  func.func @transform_1(%arg0: i32) -> (i32, i32) {
    %c0_i32 = arith.constant 0 : i32
    %c0_i32_0 = arith.constant 0 : i32
    %c0_i32_1 = arith.constant 0 : i32
    return %c0_i32, %c0_i32_0 : i32, i32
  }
  func.func @transform_2(%arg0: i32) -> (i32, i32) {
    %c0_i32 = arith.constant 0 : i32
    %c0_i32_0 = arith.constant 0 : i32
    %c0_i32_1 = arith.constant 0 : i32
    return %c0_i32, %c0_i32_0 : i32, i32
  }
  func.func @transform_3(%arg0: i32) -> (i32, i32) {
    %c0_i32 = arith.constant 0 : i32
    %c0_i32_0 = arith.constant 0 : i32
    %c0_i32_1 = arith.constant 0 : i32
    return %c0_i32, %c0_i32_0 : i32, i32
  }
  func.func @transform_4(%arg0: i32) -> (i32, i32) {
    %c0_i32 = arith.constant 0 : i32
    %c0_i32_0 = arith.constant 0 : i32
    return %arg0, %c0_i32 : i32, i32
  }
}

</mosaic_0001>

<bundles_post_ra>
// kernel: tpu_custom_call.1
= control target key start
LH: loop header
LB: loop body
LE: loop exit
PB: predicated region body
PF: predicated region fallthrough
CT: control target
= control target key end

     0   :  { %9 = vsyncpa [#allocation3], 0  ;;  %s567_s0 = inlined_call_operand.hbm [shape: f32[4,12], index: 0, kind: input, shape index: {}]   ;;  %s568_s1 = inlined_call_operand.hbm [shape: f32[12,108], index: 1, kind: input, shape index: {}]   ;;  %s569_s2 = inlined_call_operand.vmem [shape: f32[1,108], index: 2, kind: input, shape index: {}]   ;;  %s570_s3 = inlined_call_operand.vmem [shape: f32[1,108], index: 3, kind: input, shape index: {}]   ;;  %s571_s4 = inlined_call_operand.hbm [shape: bf16[4,108], index: 4, kind: output, shape index: {}]  }
   0x1   :  { %10 = vsyncpa [#allocation6], 0 }
   0x2   :  { %11 = vsyncpa [#allocation4], 0  ;;  %s427_s15 = smov [#allocation2]   ;;  %s428_s17 = smov [#allocation5]  }
   0x3   :  { %s18_s16 = sshll.u32 %s427_s15, 4  ;;  %s27_s18 = sshll.u32 %s428_s17, 4  ;;  %s19_s16 = int_to_ptr.vmem [resolvable:$true] %s18_s16  ;;  %s475_s18 = int_to_ptr.vmem [resolvable:$true] %s27_s18 }
   0x4   :  { %s355_s21 = scalar_lea.hbm %s567_s0, 64 }
   0x5   :  { %p356_p0 = scmp.ne.s32.totalorder %s567_s0, %s355_s21  ;;  %p359_p1 = scmp.lt.u32.totalorder %s355_s21, %s567_s0 }
   0x7   :  { %p361_p2 = pnand %p359_p1, %p356_p0 }
   0x9   :  { %364 = shalt.err (!%p361_p2)
}
   0xa   :  { %s365_s26 = scalar_lea.vmem %s19_s16, 64  ;;  %p370_p4 = scmp.lt.s32.totalorder %s19_s16, %s19_s16 }
   0xb   :  { %p366_p3 = scmp.ne.s32.totalorder %s19_s16, %s365_s26  ;;  %p371_p5 = scmp.lt.s32.totalorder %s365_s26, %s365_s26 }
   0xd   :  { %p372_p6 = por %p371_p5, %p370_p4 }
   0xf   :  { %p373_p7 = pnand %p372_p6, %p366_p3 }
  0x11   :  { %376 = shalt.err (!%p373_p7)
}
  0x12   :  { %21 = dma.hbm_to_vmem [thread:$0]  %s567_s0, 64, %s19_s16, [#allocation3]  }
  0x13   :  { %s377_s5 = scalar_lea.hbm %s568_s1, 256 }
  0x14   :  { %p378_p8 = scmp.ne.s32.totalorder %s568_s1, %s377_s5  ;;  %p381_p9 = scmp.lt.u32.totalorder %s377_s5, %s568_s1 }
  0x16   :  { %p383_p10 = pnand %p381_p9, %p378_p8 }
  0x18   :  { %386 = shalt.err (!%p383_p10)
}
  0x19   :  { %s387_s10 = scalar_lea.vmem %s475_s18, 256  ;;  %p392_p12 = scmp.lt.s32.totalorder %s475_s18, %s475_s18 }
  0x1a   :  { %p388_p11 = scmp.ne.s32.totalorder %s475_s18, %s387_s10  ;;  %p393_p13 = scmp.lt.s32.totalorder %s387_s10, %s387_s10 }
  0x1c   :  { %p394_p0 = por %p393_p13, %p392_p12 }
  0x1e   :  { %p395_p1 = pnand %p394_p0, %p388_p11 }
  0x20   :  { %398 = shalt.err (!%p395_p1)
}
  0x21   :  { %s429_s0 = smov 128   ;;  %s430_s11 = smov 8  }
  0x22   :  { %33 = dma.hbm_to_vmem [thread:$0]  %s568_s1, 256, %s475_s18, [#allocation6], %s429_s0, %s429_s0, %s430_s11  }
  0x23   :  { %421 = dma.done.wait [#allocation3], 64  }
  0x24   :  { %422 = vsyncadd [#allocation3], 4294967232 }
  0x25   :  { %423 = dma.done.wait [#allocation6], 256  }
  0x26   :  { %424 = vsyncadd [#allocation6], 4294967040  ;;  %v431_v0 = vmov 2   ;;  %v432_v1 = vmov 0   ;;  %v53_v2 = vlaneseq  ;;  %v279_v4 = vld [vmem:[%s570_s3] sm:$0x1] }
  0x27   :  { %341 = vset.pattern.permute.xlu1 %v431_v0  ;;  %339 = vset.pattern.permute.xlu0 %v432_v1  ;;  %v44_v5 = vld [vmem:[#allocation2] sm:$0xf]  ;;  %vm280_vm0 = vcmp.ne.f32.partialorder %v279_v4, 0.0  ;;  %v433_v9 = vmov 3   ;;  %v434_v10 = vmov 1   ;;  %v435_v11 = vmov 4  }
  0x28   :  { %v506_v3 = vshrl.u32 %v53_v2, 7  ;;  %76 = vperm.xlu1 %341, %v44_v5   ;;  %50 = vperm.xlu0 %339, %v44_v5   ;;  %v514_v7 = vsel %vm280_vm0, 1, %v432_v1  ;;  %v436_v12 = vmov 5   ;;  %v437_v13 = vmov 6   ;;  %v45_v19 = vld [vmem:[#allocation5] sm:$0xff] }
  0x29   :  { %v438_v14 = vmov 8   ;;  %v439_v15 = vmov 7   ;;  %v440_v16 = vmov 11   ;;  %v441_v17 = vmov 9   ;;  %v307_v25 = vld [vmem:[%s569_s2] ss:$0 sm:$0xff] }
  0x2a   :  { %v512_v6 = vsub.s32 0, %v506_v3  ;;  %v442_v18 = vmov 10   ;;  %v71_v21 = vsub.s32 1, %v506_v3  ;;  %v81_v22 = vsub.s32 2, %v506_v3  ;;  %v46_v53 = vld [vmem:[#allocation5 + $0x8] sm:$0xf] }
  0x2b   :  { %v91_v27 = vsub.s32 3, %v506_v3  ;;  %v101_v29 = vsub.s32 4, %v506_v3  ;;  %v111_v34 = vsub.s32 5, %v506_v3  ;;  %v121_v41 = vsub.s32 6, %v506_v3  ;;  %s449_s2 = smov [#allocation7]  }
  0x2c   :  { %v285_v8 = vrot.slane %v514_v7, %v512_v6  ;;  %342 = vset.pattern.permute.xlu1 %v433_v9  ;;  %340 = vset.pattern.permute.xlu0 %v434_v10  ;;  %v56_v20 = vrot.slane %v45_v19, %v512_v6  ;;  %v72_v28 = vrot.slane %v45_v19, %v71_v21  ;;  %v131_v50 = vsub.s32 7, %v506_v3  ;;  %s297_s16 = sshll.u32 %s449_s2, 4  ;;  %s298_s16 = int_to_ptr.vmem [resolvable:$true] %s297_s16 }
  0x2d   :  { %86 = vperm.xlu1 %342, %v44_v5   ;;  %66 = vperm.xlu0 %340, %v44_v5   ;;  %v82_v30 = vrot.slane %v45_v19, %v81_v22  ;;  %v92_v35 = vrot.slane %v45_v19, %v91_v27  ;;  %v102_v37 = vrot.slane %v45_v19, %v101_v29  ;;  %v444_v29 = vmov 920167782   ;;  %s399_s17 = scalar_lea.vmem %s298_s16, 32  ;;  %p404_p3 = scmp.lt.s32.totalorder %s298_s16, %s298_s16 }
  0x2e   :  { %v112_v40 = vrot.slane %v45_v19, %v111_v34  ;;  %v122_v49 = vrot.slane %v45_v19, %v121_v41  ;;  %v132_v56 = vrot.slane %v45_v19, %v131_v50  ;;  %v142_v57 = vrot.slane %v46_v53, %v512_v6  ;;  %p400_p2 = scmp.ne.s32.totalorder %s298_s16, %s399_s17  ;;  %p405_p4 = scmp.lt.s32.totalorder %s399_s17, %s399_s17 }
  0x2f   :  { %v152_v0 = vrot.slane %v46_v53, %v71_v21  ;;  %v172_v3 = vrot.slane %v46_v53, %v91_v27  ;;  %v443_v27 = vmov 2102212464   ;;  %vm286_vm12 = vcmp.eq.s32.totalorder %v285_v8, 1 }
  0x30   :  { %vm289_vm15 = vcmask 877568   ;;  %p406_p5 = por %p405_p4, %p404_p3 }
  0x31   :  { %343 = vset.pattern.permute.xlu1 %v435_v11  ;;  %344 = vset.pattern.permute.xlu0 %v436_v12 }
  0x32   :  { %96 = vperm.xlu1 %343, %v44_v5   ;;  %106 = vperm.xlu0 %344, %v44_v5   ;;  %p407_p6 = pnand %p406_p5, %p400_p2 }
  0x36   :  { %345 = vset.pattern.permute.xlu1 %v437_v13  ;;  %347 = vset.pattern.permute.xlu0 %v438_v14 }
  0x37   :  { %116 = vperm.xlu1 %345, %v44_v5   ;;  %136 = vperm.xlu0 %347, %v44_v5  }
  0x3b   :  { %346 = vset.pattern.permute.xlu1 %v439_v15  ;;  %350 = vset.pattern.permute.xlu0 %v440_v16 }
  0x3c   :  { %126 = vperm.xlu1 %346, %v44_v5   ;;  %166 = vperm.xlu0 %350, %v44_v5  }
  0x40   :  { %348 = vset.pattern.permute.xlu1 %v441_v17 }
  0x41   :  { %146 = vperm.xlu1 %348, %v44_v5  }
  0x45   :  { %349 = vset.pattern.permute.xlu1 %v442_v18 }
  0x46   :  { %156 = vperm.xlu1 %349, %v44_v5   ;;  %v162_v5 = vrot.slane %v46_v53, %v81_v22 }
  0xa7   :  { %v77_v23 = vpop.permute.xlu1 %76  ;;  %v51_v24 = vpop.permute.xlu0 %50 }
  0xa8   :  { %v57_v26 = vmul.f32 %v56_v20, %v51_v24  ;;  %v83_v38 = vmul.f32 %v82_v30, %v77_v23 }
  0xaa   :  { %v64_v31 = vadd.f32 %v307_v25, %v57_v26 }
  0xac   :  { %v87_v32 = vpop.permute.xlu1 %86  ;;  %v67_v33 = vpop.permute.xlu0 %66 }
  0xad   :  { %v73_v36 = vmul.f32 %v72_v28, %v67_v33  ;;  %v93_v42 = vmul.f32 %v92_v35, %v87_v32  ;;  %v445_v33 = vmov 1326507024   ;;  %v446_v35 = vmov 683565275  }
  0xaf   :  { %v74_v39 = vadd.f32 %v73_v36, %v64_v31 }
  0xb1   :  { %v84_v43 = vadd.f32 %v83_v38, %v74_v39  ;;  %v97_v44 = vpop.permute.xlu1 %96  ;;  %v107_v45 = vpop.permute.xlu0 %106 }
  0xb2   :  { %v103_v46 = vmul.f32 %v102_v37, %v97_v44  ;;  %v113_v48 = vmul.f32 %v112_v40, %v107_v45  ;;  %v447_v37 = vmov 2475754826   ;;  %v448_v40 = vmov 2131351028  }
  0xb3   :  { %v94_v47 = vadd.f32 %v93_v42, %v84_v43 }
  0xb5   :  { %v104_v51 = vadd.f32 %v103_v46, %v94_v47 }
  0xb6   :  { %v117_v52 = vpop.permute.xlu1 %116  ;;  %v137_v59 = vpop.permute.xlu0 %136 }
  0xb7   :  { %v114_v54 = vadd.f32 %v113_v48, %v104_v51  ;;  %v123_v55 = vmul.f32 %v122_v49, %v117_v52  ;;  %v143_v63 = vmul.f32 %v142_v57, %v137_v59 }
  0xb9   :  { %v124_v60 = vadd.f32 %v123_v55, %v114_v54 }
  0xbb   :  { %v127_v58 = vpop.permute.xlu1 %126  ;;  %v167_v9 = vpop.permute.xlu0 %166 }
  0xbc   :  { %v133_v61 = vmul.f32 %v132_v56, %v127_v58  ;;  %v173_v13 = vmul.f32 %v172_v3, %v167_v9 }
  0xbe   :  { %v134_v62 = vadd.f32 %v133_v61, %v124_v60 }
  0xc0   :  { %v147_v1 = vpop.permute.xlu1 %146  ;;  %v144_v2 = vadd.f32 %v143_v63, %v134_v62 }
  0xc1   :  { %v153_v4 = vmul.f32 %v152_v0, %v147_v1 }
  0xc3   :  { %v154_v11 = vadd.f32 %v153_v4, %v144_v2 }
  0xc5   :  { %v157_v10 = vpop.permute.xlu1 %156 }
  0xc6   :  { %v163_v12 = vmul.f32 %v162_v5, %v157_v10 }
  0xc8   :  { %v164_v14 = vadd.f32 %v163_v12, %v154_v11 }
  0xca   :  { %v530_v15 = vadd.f32 %v173_v13, %v164_v14 }
  0xcc   :  { %v178_v16 = vand.u32 2139095040, %v530_v15  ;;  %v175_v17 = vand.u32 2147483647, %v530_v15  ;;  %vm177_vm8 = vcmp.lt.s32.totalorder %v530_v15, 0  ;;  %vm267_vm14 = vweird.f32 %v530_v15 }
  0xce   :  { %v179_v18 = vshrl.u32 %v178_v16, 23  ;;  %v182_v20 = vand.u32 8388607, %v175_v17  ;;  %vm176_vm9 = vcmp.le.f32.partialorder %v175_v17, 0.7853982 }
  0xd0   :  { %v308_v19 = vadd.s32 4294967169, %v179_v18  ;;  %v183_v23 = vor.u32 8388608, %v182_v20 }
  0xd2   :  { %v185_v21 = vadd.s32 1, %v308_v19  ;;  %v223_v31 = vshll.u32 %v183_v23, 8 }
  0xd4   :  { %vm186_vm1 = vcmp.gt.s32.totalorder %v185_v21, 0 }
  0xd5   :  { %v187_v22 = vsel %vm186_vm1, %v185_v21, 0 }
  0xd6   :  { %v189_v24 = vand.u32 31, %v187_v22  ;;  %v188_v25 = vshrl.u32 %v187_v22, 5 }
  0xd8   :  { %v190_v26 = vsub.s32 32, %v189_v24  ;;  %v201_v28 = vshll.u32 %v443_v27, %v189_v24  ;;  %v204_v30 = vshll.u32 %v444_v29, %v189_v24  ;;  %v192_v36 = vshll.u32 %v446_v35, %v189_v24 }
  0xd9   :  { %v195_v39 = vshll.u32 %v447_v37, %v189_v24  ;;  %v198_v42 = vshll.u32 %v448_v40, %v189_v24  ;;  %vm210_vm2 = vcmp.lt.s32.totalorder %v188_v25, 4  ;;  %vm207_vm3 = vcmp.lt.s32.totalorder %v188_v25, 1 }
  0xda   :  { %v202_v32 = vshrl.u32 %v444_v29, %v190_v26  ;;  %v205_v34 = vshrl.u32 %v445_v33, %v190_v26  ;;  %v193_v38 = vshrl.u32 %v447_v37, %v190_v26  ;;  %v196_v41 = vshrl.u32 %v448_v40, %v190_v26 }
  0xdb   :  { %v199_v43 = vshrl.u32 %v443_v27, %v190_v26  ;;  %v191_v47 = vshrl.u32 %v446_v35, %v190_v26  ;;  %vm208_vm4 = vcmp.lt.s32.totalorder %v188_v25, 2  ;;  %vm209_vm5 = vcmp.lt.s32.totalorder %v188_v25, 3 }
  0xdc   :  { %v203_v44 = vor.u32 %v202_v32, %v201_v28  ;;  %v206_v45 = vor.u32 %v205_v34, %v204_v30  ;;  %v194_v46 = vor.u32 %v193_v38, %v192_v36  ;;  %v197_v48 = vor.u32 %v196_v41, %v195_v39 }
  0xdd   :  { %v200_v49 = vor.u32 %v199_v43, %v198_v42 }
  0xde   :  { %v216_v50 = vsel %vm210_vm2, %v203_v44, 920167782  ;;  %v220_v51 = vsel %vm210_vm2, %v206_v45, 1326507024  ;;  %v215_v53 = vsel %vm207_vm3, %v194_v46, %v197_v48  ;;  %v211_v56 = vsel %vm207_vm3, %v191_v47, %v194_v46 }
  0xdf   :  { %v212_v52 = vsel %vm210_vm2, %v200_v49, 2102212464  ;;  %v217_v54 = vsel %vm209_vm5, %v200_v49, %v216_v50  ;;  %v219_v55 = vsel %vm207_vm3, %v197_v48, %v200_v49  ;;  %v221_v59 = vsel %vm209_vm5, %v203_v44, %v220_v51 }
  0xe0   :  { %v213_v57 = vsel %vm209_vm5, %v197_v48, %v212_v52  ;;  %v218_v58 = vsel %vm208_vm4, %v215_v53, %v217_v54  ;;  %v222_v60 = vsel %vm208_vm4, %v219_v55, %v221_v59 }
  0xe1   :  { %v536_v61 = vmul.u32.u64.low %v223_v31, %v218_v58  ;;  %v537_v62 = vmul.u32.u64.high %v223_v31, %v218_v58, %v536_v61  ;;  %v539_v63 = vmul.u32.u64.low %v223_v31, %v222_v60  ;;  %v540_v0 = vmul.u32.u64.high %v223_v31, %v222_v60, %v539_v63 }
  0xe2   :  { %v214_v1 = vsel %vm208_vm4, %v211_v56, %v213_v57 }
  0xe3   :  { %v233_v2 = vadd.s32 1, %v537_v62  ;;  %v230_v4 = vmul.u32 %v223_v31, %v214_v1  ;;  %vm232_vm6 = vc.u32 %v540_v0, %v536_v61  ;;  %v231_v20 = vadd.s32 %v536_v61, %v540_v0 }
  0xe5   :  { %v234_v5 = vsel %vm232_vm6, %v233_v2, %v537_v62 }
  0xe6   :  { %v235_v3 = vadd.s32 %v234_v5, %v230_v4 }
  0xe8   :  { %v236_v9 = vadd.s32 536870912, %v235_v3 }
  0xea   :  { %v237_v10 = vshrl.u32 %v236_v9, 30 }
  0xec   :  { %v238_v11 = vshll.u32 %v237_v10, 30  ;;  %v261_v32 = vsub.s32 4, %v237_v10 }
  0xee   :  { %v239_v12 = vsub.s32 %v235_v3, %v238_v11  ;;  %v262_v35 = vsel %vm177_vm8, %v261_v32, %v237_v10 }
  0xef   :  { %v264_v37 = vsel %vm176_vm9, 0, %v262_v35 }
  0xf0   :  { %v241_v13 = vsub.s32 0, %v239_v12  ;;  %v268_v38 = vadd.s32 3, %v264_v37 }
  0xf2   :  { %v309_v14 = vmin.u32 %v241_v13, %v239_v12  ;;  %v269_v39 = vand.u32 3, %v268_v38 }
  0xf4   :  { %v243_v16 = vclz %v309_v14  ;;  %vm274_vm10 = vcmp.eq.s32.totalorder %v269_v39, 2  ;;  %vm271_vm11 = vcmp.eq.s32.totalorder %v269_v39, 0  ;;  %vm270_vm13 = vcmp.lt.s32.totalorder %v269_v39, 2 }
  0xf6   :  { %v310_v18 = vadd.s32 4294967294, %v243_v16 }
  0xf8   :  { %vm311_vm7 = vcmp.lt.s32.totalorder %v310_v18, 0 }
  0xf9   :  { %v246_v19 = vsel %vm311_vm7, 0, %v310_v18 }
  0xfa   :  { %v247_v21 = vsub.s32 32, %v246_v19  ;;  %v251_v22 = vsub.s32 4294967266, %v246_v19  ;;  %v248_v23 = vshll.u32 %v239_v12, %v246_v19 }
  0xfc   :  { %v249_v24 = vshrl.u32 %v231_v20, %v247_v21  ;;  %v252_v25 = vadd.s32 127, %v251_v22 }
  0xfe   :  { %v250_v26 = vor.u32 %v249_v24, %v248_v23  ;;  %v253_v27 = vshll.u32 %v252_v25, 23 }
 0x100   :  { %v254_v28 = vor.u32 4788187, %v253_v27  ;;  %v257_v30 = vcvt.s32.f32 %v250_v26 }
 0x102   :  { %v255_v29 = vand.u32 2147483647, %v254_v28 }
 0x104   :  { %v258_v31 = vmul.f32 %v257_v30, %v255_v29 }
 0x106   :  { %v259_v33 = vxor.u32 2147483648, %v258_v31 }
 0x108   :  { %v260_v34 = vsel %vm177_vm8, %v259_v33, %v258_v31 }
 0x109   :  { %v263_v36 = vsel %vm176_vm9, %v530_v15, %v260_v34 }
 0x10a   :  { %351 = vcosq.f32 %v263_v36 }
 0x10b   :  { %353 = vsinq.f32 %v263_v36 }
 0x114   :  { %v352_v40 = vpop.eup %351 }
 0x115   :  { %v354_v41 = vpop.eup %353  ;;  %v275_v42 = vxor.u32 2147483648, %v352_v40 }
 0x116   :  { %v272_v43 = vxor.u32 2147483648, %v354_v41 }
 0x117   :  { %v276_v44 = vsel %vm274_vm10, %v275_v42, %v354_v41 }
 0x118   :  { %v273_v17 = vsel %vm271_vm11, %v352_v40, %v272_v43 }
 0x119   :  { %v277_v45 = vsel %vm270_vm13, %v273_v17, %v276_v44 }
 0x11a   :  { %v278_v46 = vsel %vm267_vm14, nan, %v277_v45 }
 0x11b   :  { %v287_v47 = vsel %vm286_vm12, %v530_v15, %v278_v46 }
 0x11c   :  { %v288_v48 = vpack.c.bf16 %v287_v47, %v287_v47 }
 0x11e   :  { %290 = vst.msk [vmem:[#allocation7] sm:$0x3] %vm289_vm15, %v288_v48 }
 0x11f   :  { %410 = shalt.err (!%p407_p6)
}
 0x120   :  { %s411_s20 = scalar_lea.hbm %s571_s4, 32 }
 0x121   :  { %p412_p7 = scmp.ne.s32.totalorder %s571_s4, %s411_s20  ;;  %p415_p8 = scmp.lt.u32.totalorder %s411_s20, %s571_s4 }
 0x123   :  { %p417_p9 = pnand %p415_p8, %p412_p7 }
 0x125   :  { %420 = shalt.err (!%p417_p9)
}
 0x126   :  { %300 = dma.vmem_to_hbm [thread:$0]  %s298_s16, 32, %s571_s4, [#allocation4]  }
 0x127   :  { %425 = dma.done.wait [#allocation4], 32  }
 0x128   :  { %426 = vsyncadd [#allocation4], 4294967264 }
 0x129   :  { %304 = vsyncpa [#allocation3], 1 }
 0x12a   :  { %305 = vsyncpa [#allocation6], 1 }
 0x12b   :  { %306 = vsyncpa [#allocation4], 1 }

</bundles_post_ra>
